<compile_context>
chip_gen: v5e
topology: v5e:2x2
jax: 0.10.0
libtpu: 0.0.40
codegen_flags: <defaults>
</compile_context>

<pallas_src>
import math

import jax
import jax.numpy as jnp
from jax.experimental import pallas as pl
from jax.experimental.pallas import tpu as pltpu


def _round_up(n, m):
    return ((n + m - 1) // m) * m


def _kernel_aligned(freqs_ref, x_ref, o_ref):
    # freqs_ref: (1, half) f32 with half % 128 == 0
    # x_ref:     (TB, 1) f32
    # o_ref:     (TB, dim) f32
    half = freqs_ref.shape[1]
    emb = x_ref[...] * freqs_ref[...]              # (TB, half) broadcast (VPU)
    o_ref[:, :half] = jnp.sin(emb)                 # lane-aligned, unmasked
    o_ref[:, half:] = jnp.cos(emb)                 # lane-aligned, unmasked


def _kernel_full(freqs_full_ref, x_ref, o_ref):
    # freqs_full_ref: (1, dim) f32 = [freqs, freqs]
    # Single full-width store; sin/cos selected per lane (exact vs reference,
    # no masked half-width stores, no lane-offset writes).
    dim = o_ref.shape[1]
    half = dim // 2
    emb = x_ref[...] * freqs_full_ref[...]         # (TB, dim)
    is_sin = jax.lax.broadcasted_iota(jnp.int32, emb.shape, 1) < half
    o_ref[...] = jnp.where(is_sin, jnp.sin(emb), jnp.cos(emb))


def sinusoidal_pos_emb(x, dim, block_b=None):
    """x: (B,) or (B, 1) timesteps -> (B, dim) float32 sinusoidal embedding."""
    assert dim % 2 == 0 and dim >= 4, "dim must be even and >= 4 (half_dim > 1)"
    half = dim // 2

    x = jnp.asarray(x, jnp.float32)
    if x.ndim == 1:
        x = x[:, None]
    assert x.ndim == 2 and x.shape[1] == 1, "x must be (B,) or (B, 1)"
    B = x.shape[0]

    # Frequencies computed once (hoisted out of the grid), identical to torch.
    scale = math.log(10000.0) / (half - 1)
    freqs = jnp.exp(jnp.arange(half, dtype=jnp.float32) * -scale)[None, :]

    aligned = (half % 128 == 0)
    if aligned:
        kernel = _kernel_aligned
        freqs_in = freqs                                        # (1, half)
    else:
        kernel = _kernel_full
        freqs_in = jnp.concatenate([freqs, freqs], axis=-1)     # (1, dim)

    # ---- tile-size selection -------------------------------------------------
    # ~8 MiB output tile (16 MiB double-buffered) amortizes the per-step
    # overhead; row cap 4096 bounds the lane-padded (TB, 1) x buffer.
    if block_b is None:
        budget = 8 * 1024 * 1024
        block_b = max(8, min(4096, budget // (dim * 4)))
    # v7x megacore: keep at least ~4 grid blocks when B allows so both
    # TensorCores get work (no-op on single-TC v5e/v6e and for tiny B).
    megacore_cap = _round_up(pl.cdiv(B, 4), 8)
    TB = max(8, min(block_b, megacore_cap))
    TB = (TB // 8) * 8

    grid = (pl.cdiv(B, TB),)   # ragged last block handled by Pallas masking

    cost = pl.CostEstimate(
        flops=B * dim,                    # the x*freqs multiplies (+ select)
        transcendentals=B * dim,          # one sin/cos per output element
        bytes_accessed=B * dim * 4 + B * 4 + int(freqs_in.size) * 4,
    )

    return pl.pallas_call(
        kernel,
        out_shape=jax.ShapeDtypeStruct((B, dim), jnp.float32),
        grid_spec=pltpu.PrefetchScalarGridSpec(
            num_scalar_prefetch=0,
            grid=grid,
            in_specs=[
                # constant block -> fetched once, not per grid step
                pl.BlockSpec(tuple(freqs_in.shape), lambda i: (0, 0)),
                pl.BlockSpec((TB, 1), lambda i: (i, 0)),
            ],
            out_specs=pl.BlockSpec((TB, dim), lambda i: (i, 0)),
        ),
        compiler_params=pltpu.CompilerParams(
            dimension_semantics=("parallel",),
            # explicit ceiling: fits v7x's 64 MiB physical VMEM with headroom,
            # and lifts the 16/32 MiB default scoped limits on v5e/v6e.
            vmem_limit_bytes=48 * 1024 * 1024,
        ),
        cost_estimate=cost,
    )(freqs_in, x)


def _reference(x, dim):
    # Pure-JAX reference mirroring the PyTorch forward.
    x = jnp.asarray(x, jnp.float32)
    if x.ndim == 1:
        x = x[:, None]
    half_dim = dim // 2
    e = math.log(10000.0) / (half_dim - 1)
    freqs = jnp.exp(jnp.arange(half_dim, dtype=jnp.float32) * -e)
    emb = x * freqs[None, :]
    return jnp.concatenate([jnp.sin(emb), jnp.cos(emb)], axis=-1)


if __name__ == "__main__":
    key = jax.random.PRNGKey(0)
    # Small DDPM-style shapes; B=10 is deliberately NOT a multiple of the
    # 8-row tile, exercising the ragged (masked) last block with no pad/slice.
    B, dim = 10, 32
    x = jax.random.uniform(key, (B,), dtype=jnp.float32, minval=0.0, maxval=1000.0)

    out = jax.block_until_ready(sinusoidal_pos_emb(x, dim))
    ref = _reference(x, dim)

    assert out.shape == (B, dim), out.shape
    assert out.dtype == jnp.float32, out.dtype
    assert jnp.allclose(out, ref, atol=1e-5, rtol=1e-5), float(jnp.max(jnp.abs(out - ref)))

    print("KERNEL_OK")
</pallas_src>

<mosaic_0001>
module attributes {stable_mosaic.version = 11 : i64} {
  func.func @_kernel_full(%arg0: i32, %arg1: memref<1x32xf32, #tpu.memory_space<vmem>>, %arg2: memref<8x1xf32, #tpu.memory_space<vmem>>, %arg3: memref<8x32xf32, #tpu.memory_space<vmem>>) attributes {dimension_semantics = [#tpu.dimension_semantics<parallel>], iteration_bounds = array<i64: 2>, scalar_prefetch = 0 : i64, scratch_operands = 0 : i64, tpu.core_type = #tpu.core_type<tc>, window_params = [{pipeline_mode = #tpu.pipeline_mode<synchronous>, transform_indices = @transform_0, window_bounds = array<i64: 1, 32>}, {transform_indices = @transform_1, window_bounds = array<i64: 8, 1>}, {transform_indices = @transform_2, window_bounds = array<i64: 8, 32>}]} {
    %c0 = arith.constant 0 : index
    %c0_0 = arith.constant 0 : index
    %0 = vector.load %arg2[%c0, %c0_0] : memref<8x1xf32, #tpu.memory_space<vmem>>, vector<8x1xf32>
    %c0_1 = arith.constant 0 : index
    %c0_2 = arith.constant 0 : index
    %1 = vector.load %arg1[%c0_1, %c0_2] : memref<1x32xf32, #tpu.memory_space<vmem>>, vector<1x32xf32>
    %2 = vector.broadcast %0 : vector<8x1xf32> to vector<8x32xf32>
    %3 = vector.broadcast %1 : vector<1x32xf32> to vector<8x32xf32>
    %4 = arith.mulf %2, %3 : vector<8x32xf32>
    %5 = tpu.iota {dimensions = array<i32: 1>} : vector<8x32xi32>
    %c16_i32 = arith.constant 16 : i32
    %6 = vector.broadcast %c16_i32 : i32 to vector<8x32xi32>
    %7 = arith.cmpi slt, %5, %6 : vector<8x32xi32>
    %8 = math.sin %4 : vector<8x32xf32>
    %9 = math.cos %4 : vector<8x32xf32>
    %10 = arith.select %7, %8, %9 : vector<8x32xi1>, vector<8x32xf32>
    %c0_3 = arith.constant 0 : index
    %c0_4 = arith.constant 0 : index
    %11 = vector.load %arg3[%c0_3, %c0_4] : memref<8x32xf32, #tpu.memory_space<vmem>>, vector<8x32xf32>
    tpu.vector_store %arg3[%c0_3, %c0_4], %10 {strides = array<i32>} : memref<8x32xf32, #tpu.memory_space<vmem>>, vector<8x32xf32>,
    return
  }
  func.func @transform_0(%arg0: i32) -> (i32, i32) {
    %c0_i32 = arith.constant 0 : i32
    %c0_i32_0 = arith.constant 0 : i32
    %c0_i32_1 = arith.constant 0 : i32
    return %c0_i32, %c0_i32_0 : i32, i32
  }
  func.func @transform_1(%arg0: i32) -> (i32, i32) {
    %c0_i32 = arith.constant 0 : i32
    %c0_i32_0 = arith.constant 0 : i32
    return %arg0, %c0_i32 : i32, i32
  }
  func.func @transform_2(%arg0: i32) -> (i32, i32) {
    %c0_i32 = arith.constant 0 : i32
    %c0_i32_0 = arith.constant 0 : i32
    return %arg0, %c0_i32 : i32, i32
  }
}

</mosaic_0001>

<bundles_post_ra>
// kernel: tpu_custom_call.1
= control target key start
LH: loop header
LB: loop body
LE: loop exit
PB: predicated region body
PF: predicated region fallthrough
CT: control target
= control target key end

     0   :  { %7 = vsyncpa [#allocation3], 0  ;;  %s851_s0 = inlined_call_operand.vmem [shape: f32[1,32], index: 0, kind: input, shape index: {}]   ;;  %s852_s1 = inlined_call_operand.vmem [shape: f32[10,1], index: 1, kind: input, shape index: {}]   ;;  %s853_s2 = inlined_call_operand.hbm [shape: f32[10,32], index: 2, kind: output, shape index: {}]  }
   0x1   :  { %9 = vsyncpa [#allocation3 + $0x1], 0  ;;  %s690_s9 = smov 0   ;;  %s692_s10 = smov 0  }
   0x2   :  { %s694_s11 = smov 0   ;;  %s696_s12 = smov 0  }
   0x3 LB: > { %s711_s13 = sadd.s32 4294967295, %s666_s12   ;;  %s540_s14 = sadd.s32 4294967294, %s666_s12   ;;  %s666_s12 = sphi %s696_s12, %s859_s12   ;;  %s662_s11 = sphi %s694_s11, %s858_s11   ;;  %s658_s10 = sphi %s692_s10, %s857_s10   ;;  %s654_s9 = sphi %s690_s9, %s856_s9  }
   0x4   : > { %s715_s15 = sadd.s32 1, %s666_s12   ;;  %s69_s16 = sadd.s32 1, %s662_s11 }
   0x5   : > { %s66_s17 = ssub.s32 %s666_s12, %s715_s15  ;;  %p79_p0 = scmp.ne.s32.totalorder %s662_s11, %s658_s10 }
   0x6   : > { %p67_p1 = scmp.eq.s32.totalorder %s66_s17, 0  ;;  %p80_p2 = scmp.eq.s32.totalorder %s711_s13, 1 }
   0x7   : > { %p85_p3 = scmp.ne.s32.totalorder %s658_s10, %s654_s9  ;;  %p86_p4 = scmp.eq.s32.totalorder %s540_s14, 1 }
   0x8   : > { %s726_s18 = scalar_select %p67_p1, %s662_s11, %s69_s16  }
   0x9   : > { %p728_p5 = por %p80_p2, %p79_p0  ;;  %p732_p6 = por %p86_p4, %p85_p3 }
   0xa   : > { %p543_p7 = scmp.ge.s32.totalorder %s666_s12, 1  ;;  %p114_p8 = scmp.lt.s32.totalorder %s666_s12, 3 }
   0xc   : > { %p115_p9 = pnand %p543_p7, %p114_p8 }
   0xd   : > { %p135_p10 = scmp.lt.s32.totalorder (!%p115_p9), %s711_s13, 1  ;;  %s132_s28 = sand.u32 (!%p115_p9), 1, %s658_s10  }
   0xe   : > { %118 = sbr.rel (%p115_p9) target bundleno = 241 (0xf1), region = 28  ;;  %s809_s29 = sshll.u32 (!%p115_p9), %s132_s28, 3 }
   0xf   : > { %s553_s30 = sshll.u32 (!%p115_p9), %s711_s13, 3  ;;  %s134_s6 = scalar_lea.vmem (!%p115_p9), [#allocation2], %s809_s29 }
  0x10   : > { %s476_s5 = scalar_lea.hbm (!%p115_p9), %s853_s2, %s553_s30  ;;  %s816_s7 = sshll.u32 (!%p115_p9), %s134_s6, 4  ;;  %s479_s7 = int_to_ptr.vmem [resolvable:$true] %s816_s7 }
  0x11   : > { %s480_s8 = sshll.u32 (!%p115_p9), %s476_s5, 4  ;;  %s481_s8 = int_to_ptr.hbm [resolvable:$true] %s480_s8 }
  0x12   : > { %s618_s14 = sshra.s32 (!%p115_p9), %s481_s8, 4  ;;  %s619_s14 = int_to_ptr.hbm [resolvable:$true] %s618_s14 }
  0x13   : > { %v668_v0 = vmov 0   ;;  %s136_s21 = scalar_select %p135_p10, %s711_s13, 1  ;;  %v603_v2 = vld [vmem:[%s851_s0] ss:$0 sm:$0xff]  ;;  %v669_v16 = vmov 683565275  }
  0x14   : > { %602 = vset.pattern.permute.xlu0 %v668_v0  ;;  %v670_v18 = vmov 2475754826   ;;  %v671_v21 = vmov 2131351028   ;;  %v672_v24 = vmov 2102212464   ;;  %p625_p0 = scmp.lt.s32.totalorder %s619_s14, %s853_s2 }
  0x15   : > { %s545_s22 = sshll.u32 %s136_s21, 3  ;;  %v673_v27 = vmov 920167782   ;;  %v674_v30 = vmov 1326507024   ;;  %s466_s13 = scalar_lea.sflag [#allocation3], %s132_s28 }
  0x16   : > { %s138_s25 = scalar_lea.vmem %s852_s1, %s545_s22  ;;  %s620_s16 = scalar_lea.hbm %s619_s14, 8 }
  0x17   : > { %v139_v1 = vld [vmem:[%s138_s25] sm:$0xff]  ;;  %p621_p11 = scmp.ne.s32.totalorder %s619_s14, %s620_s16  ;;  %s624_s22 = scalar_lea.hbm %s853_s2, 16 }
  0x18   : > { %143 = vperm.xlu0 %602, %v139_v1   ;;  %p626_p1 = scmp.lt.s32.totalorder %s624_s22, %s620_s16 }
  0x19   : > { %p622_p12 = pnand %p621_p11, %p728_p5 }
  0x1a   : > { %p627_p2 = por %p626_p1, %p625_p0 }
  0x1b   : > { %p623_p13 = pneg %p622_p12 }
  0x1d   : > { %p628_p3 = pnand %p627_p2, %p623_p13 }
  0x8a   : > { %v144_v3 = vpop.permute.xlu0 %143 }
  0x8b   : > { %v747_v4 = vmul.f32 %v603_v2, %v144_v3 }
  0x8d   : > { %v156_v5 = vand.u32 2139095040, %v747_v4  ;;  %v153_v8 = vand.u32 2147483647, %v747_v4  ;;  %vm155_vm12 = vcmp.lt.s32.totalorder %v747_v4, 0 }
  0x8f   : > { %v157_v6 = vshrl.u32 %v156_v5, 23  ;;  %v160_v10 = vand.u32 8388607, %v153_v8  ;;  %vm154_vm13 = vcmp.le.f32.partialorder %v153_v8, 0.7853982 }
  0x91   : > { %v546_v7 = vadd.s32 4294967169, %v157_v6  ;;  %v161_v14 = vor.u32 8388608, %v160_v10 }
  0x93   : > { %v163_v9 = vadd.s32 1, %v546_v7  ;;  %v764_v37 = vshll.u32 %v161_v14, 8 }
  0x95   : > { %vm164_vm0 = vcmp.gt.s32.totalorder %v163_v9, 0  ;;  %v202_v46 = vand.u32 65535, %v764_v37  ;;  %v203_v47 = vshrl.u32 %v764_v37, 16 }
  0x96   : > { %v165_v11 = vsel %vm164_vm0, %v163_v9, 0 }
  0x97   : > { %v167_v12 = vand.u32 31, %v165_v11  ;;  %v755_v15 = vshrl.u32 %v165_v11, 5 }
  0x99   : > { %v753_v13 = vsub.s32 32, %v167_v12  ;;  %v170_v17 = vshll.u32 %v669_v16, %v167_v12  ;;  %v173_v19 = vshll.u32 %v670_v18, %v167_v12  ;;  %v176_v23 = vshll.u32 %v671_v21, %v167_v12 }
  0x9a   : > { %v179_v26 = vshll.u32 %v672_v24, %v167_v12  ;;  %v182_v29 = vshll.u32 %v673_v27, %v167_v12  ;;  %vm185_vm1 = vcmp.lt.s32.totalorder %v755_v15, 1  ;;  %vm188_vm2 = vcmp.lt.s32.totalorder %v755_v15, 4 }
  0x9b   : > { %v171_v20 = vshrl.u32 %v670_v18, %v753_v13  ;;  %v174_v22 = vshrl.u32 %v671_v21, %v753_v13  ;;  %v177_v25 = vshrl.u32 %v672_v24, %v753_v13  ;;  %v180_v28 = vshrl.u32 %v673_v27, %v753_v13 }
  0x9c   : > { %v183_v31 = vshrl.u32 %v674_v30, %v753_v13  ;;  %vm187_vm3 = vcmp.lt.s32.totalorder %v755_v15, 3  ;;  %vm186_vm4 = vcmp.lt.s32.totalorder %v755_v15, 2  ;;  %v169_v11 = vshrl.u32 %v669_v16, %v753_v13 }
  0x9d   : > { %v172_v32 = vor.u32 %v171_v20, %v170_v17  ;;  %v175_v33 = vor.u32 %v174_v22, %v173_v19  ;;  %v178_v34 = vor.u32 %v177_v25, %v176_v23  ;;  %v181_v35 = vor.u32 %v180_v28, %v179_v26 }
  0x9e   : > { %v184_v36 = vor.u32 %v183_v31, %v182_v29 }
  0x9f   : > { %v193_v38 = vsel %vm185_vm1, %v172_v32, %v175_v33  ;;  %v197_v39 = vsel %vm185_vm1, %v175_v33, %v178_v34  ;;  %v194_v40 = vsel %vm188_vm2, %v181_v35, 920167782  ;;  %v190_v7 = vsel %vm188_vm2, %v178_v34, 2102212464 }
  0xa0   : > { %v198_v41 = vsel %vm188_vm2, %v184_v36, 1326507024  ;;  %v195_v42 = vsel %vm187_vm3, %v178_v34, %v194_v40  ;;  %v189_v20 = vsel %vm185_vm1, %v169_v11, %v172_v32  ;;  %v191_v21 = vsel %vm187_vm3, %v175_v33, %v190_v7 }
  0xa1   : > { %v199_v43 = vsel %vm187_vm3, %v181_v35, %v198_v41  ;;  %v196_v44 = vsel %vm186_vm4, %v193_v38, %v195_v42  ;;  %v192_v13 = vsel %vm186_vm4, %v189_v20, %v191_v21 }
  0xa2   : > { %v200_v45 = vsel %vm186_vm4, %v197_v39, %v199_v43  ;;  %v226_v50 = vand.u32 65535, %v196_v44  ;;  %v227_v51 = vshrl.u32 %v196_v44, 16  ;;  %v246_v28 = vmul.u32 %v764_v37, %v192_v13 }
  0xa3   : > { %v204_v48 = vand.u32 65535, %v200_v45  ;;  %v205_v49 = vshrl.u32 %v200_v45, 16 }
  0xa4   : > { %v229_v54 = vmul.u32 %v227_v51, %v202_v46  ;;  %v230_v55 = vmul.u32 %v226_v50, %v203_v47  ;;  %v228_v59 = vmul.u32 %v226_v50, %v202_v46  ;;  %v231_v63 = vmul.u32 %v227_v51, %v203_v47 }
  0xa5   : > { %v207_v52 = vmul.u32 %v205_v49, %v202_v46  ;;  %v208_v53 = vmul.u32 %v204_v48, %v203_v47  ;;  %v206_v56 = vmul.u32 %v204_v48, %v202_v46  ;;  %v209_v58 = vmul.u32 %v205_v49, %v203_v47 }
  0xa6   : > { %v232_v60 = vshll.u32 %v229_v54, 16  ;;  %v234_v2 = vshll.u32 %v230_v55, 16  ;;  %v233_v18 = vshrl.u32 %v229_v54, 16  ;;  %v235_v24 = vshrl.u32 %v230_v55, 16 }
  0xa7   : > { %v210_v57 = vshll.u32 %v207_v52, 16  ;;  %v212_v61 = vshll.u32 %v208_v53, 16  ;;  %v211_v12 = vshrl.u32 %v207_v52, 16  ;;  %v213_v22 = vshrl.u32 %v208_v53, 16 }
  0xa8   : > { %vm236_vm6 = vc.u32 %v228_v59, %v232_v60  ;;  %v238_v3 = vadd.s32 %v232_v60, %v228_v59 }
  0xa9   : > { %vm214_vm5 = vc.u32 %v206_v56, %v210_v57  ;;  %v216_v62 = vadd.s32 %v210_v57, %v206_v56  ;;  %v237_v6 = vsel %vm236_vm6, 1, %v668_v0  ;;  %vm463_vm6 = vcmask 261120  }
  0xaa   : > { %v215_v1 = vsel %vm214_vm5, 1, %v668_v0  ;;  %v239_v10 = vadd.s32 %v237_v6, %v231_v63  ;;  %vm240_vm8 = vc.u32 %v238_v3, %v234_v2  ;;  %v242_v27 = vadd.s32 %v238_v3, %v234_v2 }
  0xab   : > { %v217_v5 = vadd.s32 %v215_v1, %v209_v58  ;;  %vm218_vm7 = vc.u32 %v216_v62, %v212_v61  ;;  %v241_v17 = vsel %vm240_vm8, 1, %v668_v0  ;;  %v150_v3 = vlaneseq }
  0xac   : > { %v219_v9 = vsel %vm218_vm7, 1, %v668_v0  ;;  %v243_v19 = vadd.s32 %v241_v17, %v239_v10  ;;  %vm296_vm5 = vweird.f32 %v747_v4 }
  0xad   : > { %v221_v14 = vadd.s32 %v219_v9, %v217_v5  ;;  %v151_v11 = vand.u32 127, %v150_v3 }
  0xae   : > { %v244_v25 = vadd.s32 %v243_v19, %v233_v18 }
  0xaf   : > { %v222_v23 = vadd.s32 %v221_v14, %v211_v12  ;;  %vm152_vm1 = vcmp.lt.s32.totalorder %v151_v11, 16 }
  0xb0   : > { %v245_v16 = vadd.s32 %v244_v25, %v235_v24 }
  0xb1   : > { %v223_v26 = vadd.s32 %v222_v23, %v213_v22 }
  0xb2   : > { %v249_v0 = vadd.s32 1, %v245_v16 }
  0xb3   : > { %vm248_vm9 = vc.u32 %v223_v26, %v242_v27  ;;  %v247_v15 = vadd.s32 %v242_v27, %v223_v26 }
  0xb4   : > { %v250_v29 = vsel %vm248_vm9, %v249_v0, %v245_v16 }
  0xb5   : > { %v251_v30 = vadd.s32 %v250_v29, %v246_v28 }
  0xb7   : > { %v252_v31 = vadd.s32 536870912, %v251_v30 }
  0xb9   : > { %v253_v32 = vshrl.u32 %v252_v31, 30 }
  0xbb   : > { %v254_v34 = vshll.u32 %v253_v32, 30  ;;  %v277_v53 = vsub.s32 4, %v253_v32 }
  0xbd   : > { %v255_v33 = vsub.s32 %v251_v30, %v254_v34  ;;  %v278_v58 = vsel %vm155_vm12, %v277_v53, %v253_v32 }
  0xbe   : > { %v280_v61 = vsel %vm154_vm13, 0, %v278_v58 }
  0xbf   : > { %vm256_vm10 = vcmp.lt.s32.totalorder %v255_v33, 0  ;;  %v257_v35 = vsub.s32 0, %v255_v33  ;;  %v297_v8 = vadd.s32 3, %v280_v61  ;;  %v452_v10 = vand.u32 3, %v280_v61 }
  0xc1   : > { %v258_v36 = vsel %vm256_vm10, %v257_v35, %v255_v33  ;;  %v298_v12 = vand.u32 3, %v297_v8  ;;  %vm453_vm14 = vcmp.lt.s32.totalorder %v452_v10, 2  ;;  %vm454_vm15 = vcmp.eq.s32.totalorder %v452_v10, 0 }
  0xc2   : > { %v259_v38 = vclz %v258_v36  ;;  %vm457_vm0 = vcmp.eq.s32.totalorder %v452_v10, 2 }
  0xc3   : > { %vm299_vm2 = vcmp.lt.s32.totalorder %v298_v12, 2  ;;  %vm300_vm3 = vcmp.eq.s32.totalorder %v298_v12, 0  ;;  %vm303_vm4 = vcmp.eq.s32.totalorder %v298_v12, 2 }
  0xc4   : > { %v547_v39 = vadd.s32 4294967294, %v259_v38 }
  0xc6   : > { %vm548_vm11 = vcmp.lt.s32.totalorder %v547_v39, 0 }
  0xc7   : > { %v262_v40 = vsel %vm548_vm11, 0, %v547_v39 }
  0xc8   : > { %v263_v41 = vsub.s32 32, %v262_v40  ;;  %v267_v42 = vsub.s32 4294967266, %v262_v40  ;;  %v264_v43 = vshll.u32 %v255_v33, %v262_v40 }
  0xca   : > { %v265_v44 = vshrl.u32 %v247_v15, %v263_v41  ;;  %v268_v45 = vadd.s32 127, %v267_v42 }
  0xcc   : > { %v266_v37 = vor.u32 %v265_v44, %v264_v43  ;;  %v269_v46 = vshll.u32 %v268_v45, 23 }
  0xce   : > { %v270_v47 = vor.u32 4788187, %v269_v46  ;;  %v273_v49 = vcvt.s32.f32 %v266_v37 }
  0xd0   : > { %v271_v48 = vand.u32 2147483647, %v270_v47 }
  0xd2   : > { %v274_v50 = vmul.f32 %v273_v49, %v271_v48 }
  0xd4   : > { %v275_v51 = vxor.u32 2147483648, %v274_v50 }
  0xd6   : > { %v276_v52 = vsel %vm155_vm12, %v275_v51, %v274_v50 }
  0xd7   : > { %v279_v54 = vsel %vm154_vm13, %v747_v4, %v276_v52 }
  0xd8   : > { %v281_v55 = vmul.f32 %v279_v54, %v279_v54 }
  0xda   : > { %v289_v56 = vmul.f32 -0.00019511016, %v281_v55  ;;  %v282_v57 = vmul.f32 -0.001358992, %v281_v55 }
  0xdc   : > { %v290_v59 = vadd.f32 0.008332121, %v289_v56  ;;  %v283_v60 = vadd.f32 0.041655596, %v282_v57 }
  0xde   : > { %v291_v62 = vmul.f32 %v290_v59, %v281_v55  ;;  %v284_v63 = vmul.f32 %v283_v60, %v281_v55 }
  0xe0   : > { %v292_v1 = vadd.f32 -0.16666654, %v291_v62  ;;  %v285_v2 = vadd.f32 -0.4999988, %v284_v63 }
  0xe2   : > { %v293_v5 = vmul.f32 %v292_v1, %v281_v55  ;;  %v286_v6 = vmul.f32 %v285_v2, %v281_v55 }
  0xe4   : > { %v294_v7 = vadd.f32 1.0, %v293_v5  ;;  %v287_v9 = vadd.f32 1.0, %v286_v6 }
  0xe6   : > { %v295_v14 = vmul.f32 %v294_v7, %v279_v54  ;;  %v304_v17 = vxor.u32 2147483648, %v287_v9 }
  0xe8   : > { %v301_v18 = vxor.u32 2147483648, %v295_v14  ;;  %v305_v20 = vsel %vm303_vm4, %v304_v17, %v295_v14  ;;  %v459_v22 = vsel %vm457_vm0, %v304_v17, %v295_v14 }
  0xea   : > { %v302_v19 = vsel %vm300_vm3, %v287_v9, %v301_v18  ;;  %v456_v21 = vsel %vm454_vm15, %v287_v9, %v301_v18 }
  0xeb   : > { %v306_v23 = vsel %vm299_vm2, %v302_v19, %v305_v20  ;;  %v460_v24 = vsel %vm453_vm14, %v456_v21, %v459_v22 }
  0xec   : > { %v307_v25 = vsel %vm296_vm5, nan, %v306_v23  ;;  %v461_v26 = vsel %vm296_vm5, nan, %v460_v24 }
  0xed   : > { %v462_v27 = vsel %vm152_vm1, %v307_v25, %v461_v26 }
  0xee   : > { %464 = vst.msk [vmem:[%s134_s6] sm:$0xff] %vm463_vm6, %v462_v27 }
  0xef   : > { %631 = shalt.err (!%p628_p3)
}
  0xf0   : > { %556 = dma.vmem_to_hbm [thread:$0]  (%p728_p5), %s479_s7, 128, %s481_s8, %s466_s13  }
  0xf1 PF: > { %p562_p4 = scmp.ge.s32.totalorder %s666_s12, 2  ;;  %s492_s25 = sand.u32 1, %s654_s9  }
  0xf2   : > { %s493_s26 = scalar_lea.sflag [#allocation3], %s492_s25 }
  0xf3   : > { %p559_p7 = pnand %p562_p4, %p732_p6 }
  0xf5   : > { %p560_p8 = pneg %p559_p7 }
  0xf7   : > { %649 = dma.done.wait (%p560_p8), %s493_s26, 128  }
  0xf8   : > { %651 = vsyncadd (%p560_p8), %s493_s26, 4294967168  ;;  %p12_p9 = scmp.ge.s32.totalorder %s715_s15, 4   ;;  %s856_s9 = smov %s658_s10 }
  0xf9   : > { %s857_s10 = smov %s662_s11  ;;  %s858_s11 = smov %s726_s18 }
  0xfa   : > { %s859_s12 = smov %s715_s15  ;;  %14 = sbr.rel (!%p12_p9) target bundleno = 3 (0x3), region = 63 }
  0xff   :  { %499 = vsyncpa [#allocation3], 1 }
 0x100   :  { %501 = vsyncpa [#allocation3 + $0x1], 1 }

</bundles_post_ra>
